<compile_context>
chip_gen: v5e
topology: v5e:2x2
jax: 0.10.0
libtpu: 0.0.40
codegen_flags: <defaults>
</compile_context>

<pallas_src>
import jax
import jax.numpy as jnp
from jax.experimental import pallas as pl
from jax.experimental.pallas import tpu as pltpu


def _cdiv(a: int, b: int) -> int:
    return -(-a // b)


def _round_up(x: int, m: int) -> int:
    return _cdiv(x, m) * m


def _pick_tile(dim: int, max_tile: int, align: int) -> int:
    """Pick a tile: align-multiple (or full dim), ~<= max_tile, minimal padding."""
    if dim <= align:
        return dim  # single full-dim block (always a legal block shape)
    nblocks = _cdiv(dim, max_tile)
    return _round_up(_cdiv(dim, nblocks), align)


def _tensorcores_per_chip() -> int:
    """Best-effort detection of TensorCores per chip (2 on v7x). Defaults to 1."""
    try:
        dev = jax.devices()[0]
        n = getattr(dev, "num_cores", None)
        if isinstance(n, int) and n >= 1:
            return n
        kind = (getattr(dev, "device_kind", "") or "").lower()
        if "v7" in kind or "tpu7" in kind or "7x" in kind:
            return 2
    except Exception:
        pass
    return 1


def _make_single_kernel(compute_dtype):
    """Whole-problem kernel for tiny shapes: no grid, no pipeline priming."""
    prec = (jax.lax.Precision.HIGHEST if compute_dtype is None
            else jax.lax.Precision.DEFAULT)

    def kernel(a_ref, b_ref, o_ref):
        a = a_ref[...]
        b = b_ref[...]
        if compute_dtype is not None:
            a = a.astype(compute_dtype)
            b = b.astype(compute_dtype)
        o_ref[...] = jax.lax.dot_general(
            a, b,
            dimension_numbers=(((0,), (0,)), ((), ())),
            preferred_element_type=jnp.float32,
            precision=prec,
        ).astype(o_ref.dtype)

    return kernel


def _make_tiled_kernel(rem_k: int, tk: int, compute_dtype):
    """One (tm, tn) tile of C = A^T @ B, accumulated in the resident f32 output block.

    rem_k > 0 means K % tk != 0: the last k step reads a partial A/B block whose
    out-of-bounds rows contain garbage; mask them to zero before the MXU dot.
    Garbage in partial M/N blocks is harmless (those output rows/cols are clipped).
    """
    prec = (jax.lax.Precision.HIGHEST if compute_dtype is None
            else jax.lax.Precision.DEFAULT)

    def kernel(a_ref, b_ref, o_ref):
        k = pl.program_id(2)

        @pl.when(k == 0)
        def _():
            o_ref[...] = jnp.zeros_like(o_ref)

        def accum(a, b):
            if compute_dtype is not None:
                a = a.astype(compute_dtype)
                b = b.astype(compute_dtype)
            # Contracting dim 0 of the LHS maps natively onto the MXU.
            o_ref[...] += jax.lax.dot_general(
                a, b,
                dimension_numbers=(((0,), (0,)), ((), ())),
                preferred_element_type=jnp.float32,
                precision=prec,
            )

        if rem_k == 0:
            accum(a_ref[...], b_ref[...])
        else:
            last = pl.num_programs(2) - 1

            @pl.when(k != last)
            def _():
                accum(a_ref[...], b_ref[...])

            @pl.when(k == last)
            def _():
                rows = jax.lax.broadcasted_iota(jnp.int32, (tk, 1), 0)
                keep = rows < rem_k
                accum(jnp.where(keep, a_ref[...], 0.0),
                      jnp.where(keep, b_ref[...], 0.0))

    return kernel


def matmul_transposed(A: jax.Array, B: jax.Array, *, tm=None, tn=None, tk=None,
                      cast_to_bf16: bool = False) -> jax.Array:
    """C = A^T @ B with A: (K, M), B: (K, N) -> C: (M, N) float32."""
    K, M = A.shape
    K2, N = B.shape
    assert K == K2, "A and B must share the K (contraction) dimension"
    out_dtype = jnp.float32
    compute_dtype = jnp.bfloat16 if cast_to_bf16 else None
    user_tiles = (tm is not None) or (tn is not None) or (tk is not None)

    # ---- Fast path: tiny problems -> single invocation, whole arrays in VMEM ----
    footprint_bytes = 4 * (K * M + K * N + M * N)
    if not user_tiles and footprint_bytes <= (8 << 20):
        return pl.pallas_call(
            _make_single_kernel(compute_dtype),
            out_shape=jax.ShapeDtypeStruct((M, N), out_dtype),
        )(A, B)

    # ---- Tiled path -------------------------------------------------------------
    # Large output tiles (intensity depends only on tm/tn), moderate tk, minimal
    # padding for ragged dims. 1024/1024/512 f32 double-buffered ~= 16 MiB VMEM.
    k_align = 16 if cast_to_bf16 else 8   # bf16 sublane packing needs 16
    tm = tm if tm is not None else _pick_tile(M, 1024, 128)
    tn = tn if tn is not None else _pick_tile(N, 1024, 128)
    tk = tk if tk is not None else _pick_tile(K, 512, k_align)

    # Multi-TensorCore guard (v7x): keep >= 2 parallel output blocks when possible
    # so dimension_semantics=("parallel","parallel",...) can shard across cores.
    if (not user_tiles and _cdiv(M, tm) * _cdiv(N, tn) < 2
            and _tensorcores_per_chip() >= 2):
        if M >= 256:
            tm = _round_up(_cdiv(M, 2), 128)
        elif N >= 256:
            tn = _round_up(_cdiv(N, 2), 128)

    gi, gj, gk = _cdiv(M, tm), _cdiv(N, tn), _cdiv(K, tk)
    rem_k = K % tk  # 0 => K divides tk exactly; else mask the K tail in-kernel

    # VMEM budget: double-buffered input tiles + double-buffered output tile + slack.
    tile_bytes = 2 * 4 * (tk * tm + tk * tn) + 2 * 4 * (tm * tn)
    vmem_limit = int(max(32 << 20, min(64 << 20, tile_bytes + (8 << 20))))

    kernel = _make_tiled_kernel(rem_k=rem_k, tk=tk, compute_dtype=compute_dtype)

    return pl.pallas_call(
        kernel,
        out_shape=jax.ShapeDtypeStruct((M, N), out_dtype),
        grid_spec=pltpu.PrefetchScalarGridSpec(
            num_scalar_prefetch=0,
            grid=(gi, gj, gk),
            in_specs=[
                pl.BlockSpec((tk, tm), lambda i, j, k: (k, i)),  # A tile (K-major)
                pl.BlockSpec((tk, tn), lambda i, j, k: (k, j)),  # B tile (K-major)
            ],
            out_specs=pl.BlockSpec((tm, tn), lambda i, j, k: (i, j)),
        ),
        compiler_params=pltpu.CompilerParams(
            dimension_semantics=("parallel", "parallel", "arbitrary"),
            vmem_limit_bytes=vmem_limit,
        ),
        cost_estimate=pl.CostEstimate(
            flops=2 * M * N * K,
            transcendentals=0,
            # Include operand re-reads across the parallel grid.
            bytes_accessed=4 * (M * K * gj + K * N * gi + M * N),
        ),
    )(A, B)


if __name__ == "__main__":
    key = jax.random.PRNGKey(0)
    keys = jax.random.split(key, 8)

    def ref(A, B):
        return jax.lax.dot_general(
            A, B,
            dimension_numbers=(((0,), (0,)), ((), ())),
            preferred_element_type=jnp.float32,
            precision=jax.lax.Precision.HIGHEST,
        )

    def check(C, A, B, name):
        R = ref(A, B)
        assert C.shape == R.shape, f"{name}: shape {C.shape} vs {R.shape}"
        assert jnp.allclose(C, R, atol=1e-2, rtol=1e-3), f"{name}: value mismatch"

    # 1) Tiny shape consistent with the module (A: (K, M), B: (K, N)) -> fast path.
    K, M, N = 64, 64, 128
    A = jax.random.normal(keys[0], (K, M), dtype=jnp.float32)
    B = jax.random.normal(keys[1], (K, N), dtype=jnp.float32)
    check(jax.block_until_ready(matmul_transposed(A, B)), A, B, "fast path")

    # 2) Tiled path: explicit tiles, divisible dims, K accumulation across grid.
    K, M, N = 512, 256, 384
    A = jax.random.normal(keys[2], (K, M), dtype=jnp.float32)
    B = jax.random.normal(keys[3], (K, N), dtype=jnp.float32)
    check(jax.block_until_ready(matmul_transposed(A, B, tm=128, tn=128, tk=128)),
          A, B, "tiled path")

    # 3) Tiled path with ragged dims: partial M/N blocks clipped, K tail masked.
    K, M, N = 136, 300, 200
    A = jax.random.normal(keys[4], (K, M), dtype=jnp.float32)
    B = jax.random.normal(keys[5], (K, N), dtype=jnp.float32)
    check(jax.block_until_ready(matmul_transposed(A, B, tm=128, tn=128, tk=64)),
          A, B, "ragged tiled path")

    # 4) Default tile selection on a moderate non-divisible problem.
    K, M, N = 768, 1152, 1280
    A = jax.random.normal(keys[6], (K, M), dtype=jnp.float32)
    B = jax.random.normal(keys[7], (K, N), dtype=jnp.float32)
    check(jax.block_until_ready(matmul_transposed(A, B)), A, B, "default tiled path")

    print("KERNEL_OK")
</pallas_src>

<mosaic_0001>
module attributes {stable_mosaic.version = 11 : i64} {
  func.func @kernel(%arg0: memref<64x64xf32, #tpu.memory_space<vmem>>, %arg1: memref<64x128xf32, #tpu.memory_space<vmem>>, %arg2: memref<64x128xf32, #tpu.memory_space<vmem>>) attributes {dimension_semantics = [], scalar_prefetch = 0 : i64, scratch_operands = 0 : i64, tpu.core_type = #tpu.core_type<tc>} {
    %c0 = arith.constant 0 : index
    %c0_0 = arith.constant 0 : index
    %0 = vector.load %arg0[%c0, %c0_0] : memref<64x64xf32, #tpu.memory_space<vmem>>, vector<64x64xf32>
    %c0_1 = arith.constant 0 : index
    %c0_2 = arith.constant 0 : index
    %1 = vector.load %arg1[%c0_1, %c0_2] : memref<64x128xf32, #tpu.memory_space<vmem>>, vector<64x128xf32>
    %cst = arith.constant dense<0.000000e+00> : vector<64x128xf32>
    %2 = tpu.matmul %0, %1, %cst {dimension_numbers = #tpu.dot_dimension_numbers<[0], [0], [1], [1], [0, 1, 1, 1], [], []>, precision = #tpu.contract_precision<fp32>} : vector<64x64xf32>, vector<64x128xf32>, vector<64x128xf32> -> vector<64x128xf32>
    %c0_3 = arith.constant 0 : index
    %c0_4 = arith.constant 0 : index
    %3 = vector.load %arg2[%c0_3, %c0_4] : memref<64x128xf32, #tpu.memory_space<vmem>>, vector<64x128xf32>
    tpu.vector_store %arg2[%c0_3, %c0_4], %2 {strides = array<i32>} : memref<64x128xf32, #tpu.memory_space<vmem>>, vector<64x128xf32>,
    return
  }
}

</mosaic_0001>

<bundles_post_ra>
// kernel: tpu_custom_call.1
= control target key start
LH: loop header
LB: loop body
LE: loop exit
PB: predicated region body
PF: predicated region fallthrough
CT: control target
= control target key end

     0   :  { %7 = vsyncpa [#allocation3], 0  ;;  %s874_s0 = inlined_call_operand.hbm [shape: f32[64,64], index: 0, kind: input, shape index: {}]   ;;  %s875_s1 = inlined_call_operand.hbm [shape: f32[64,128], index: 1, kind: input, shape index: {}]   ;;  %s876_s2 = inlined_call_operand.hbm [shape: f32[64,128], index: 2, kind: output, shape index: {}]  }
   0x1   :  { %8 = vsyncpa [#allocation6], 0 }
   0x2   :  { %9 = vsyncpa [#allocation4], 0  ;;  %s14_s11 = sshll.u32 %s874_s0, 4  ;;  %s699_s12 = smov [#allocation2]   ;;  %s15_s11 = int_to_ptr.hbm [resolvable:$true] %s14_s11 }
   0x3   :  { %s16_s13 = sshll.u32 %s699_s12, 4  ;;  %s27_s16 = sshll.u32 %s875_s1, 4  ;;  %s17_s13 = int_to_ptr.vmem [resolvable:$true] %s16_s13  ;;  %s28_s16 = int_to_ptr.hbm [resolvable:$true] %s27_s16 }
   0x4   :  { %s700_s17 = smov 128   ;;  %s701_s18 = smov 8  }
   0x5   :  { %22 = dma.hbm_to_vmem [thread:$0]  %s15_s11, 1024, %s17_s13, [#allocation3], %s700_s17, %s700_s17, %s701_s18  }
   0x6   :  { %s702_s19 = smov [#allocation5]  }
   0x7   :  { %s29_s20 = sshll.u32 %s702_s19, 4  ;;  %s30_s20 = int_to_ptr.vmem [resolvable:$true] %s29_s20 }
   0x8   :  { %35 = dma.hbm_to_vmem [thread:$0]  %s28_s16, 1024, %s30_s20, [#allocation6], %s700_s17, %s700_s17, %s701_s18  }
   0x9   :  { %693 = dma.done.wait [#allocation3], 1024  }
   0xa   :  { %694 = vsyncadd [#allocation3], 4294966272 }
   0xb   :  { %695 = dma.done.wait [#allocation6], 1024  }
   0xc   :  { %696 = vsyncadd [#allocation6], 4294966272  ;;  %v44_v0 = vld [vmem:[#allocation2] sm:$0xff]  ;;  %v45_v1 = vld [vmem:[#allocation2 + $0x8] sm:$0xff]  ;;  %vm92_vm0 = vcmask 523264   ;;  %s703_s0 = smov [#allocation7]  }
   0xd   :  { %60 = vxpose.xlu0.b32.start [1/8] (short) (narrow) %v44_v0, 64  ;;  %v46_v2 = vld [vmem:[#allocation2 + $0x10] sm:$0xff]  ;;  %v47_v3 = vld [vmem:[#allocation2 + $0x18] sm:$0xff]  ;;  %v57_v6 = vld [vmem:[#allocation5 + $0x28] sm:$0xff]  ;;  %s583_s1 = sshll.u32 %s703_s0, 4  ;;  %s585_s23 = sshll.u32 %s876_s2, 4  ;;  %s584_s1 = int_to_ptr.vmem [resolvable:$true] %s583_s1  ;;  %s586_s23 = int_to_ptr.hbm [resolvable:$true] %s585_s23 }
   0xe   :  { %v59_v4 = vld [vmem:[#allocation5 + $0x38] sm:$0xff]  ;;  %v58_v5 = vld [vmem:[#allocation5 + $0x30] sm:$0xff]  ;;  %v735_v9 = vand.u32 4294901760, %v57_v6  ;;  %v56_v10 = vld [vmem:[#allocation5 + $0x20] sm:$0xff] }
   0xf   :  { %v731_v7 = vand.u32 4294901760, %v59_v4  ;;  %v733_v8 = vand.u32 4294901760, %v58_v5  ;;  %v55_v11 = vld [vmem:[#allocation5 + $0x18] sm:$0xff]  ;;  %v54_v12 = vld [vmem:[#allocation5 + $0x10] sm:$0xff]  ;;  %v737_v13 = vand.u32 4294901760, %v56_v10  ;;  %v48_v21 = vld [vmem:[#allocation2 + $0x20] sm:$0xff] }
  0x10   :  { %v739_v14 = vand.u32 4294901760, %v55_v11  ;;  %v741_v15 = vand.u32 4294901760, %v54_v12  ;;  %v750_v18 = vsub.f32 %v57_v6, %v735_v9  ;;  %v49_v37 = vld [vmem:[#allocation2 + $0x28] sm:$0xff]  ;;  %v50_v42 = vld [vmem:[#allocation2 + $0x30] sm:$0xff]  ;;  %v51_v43 = vld [vmem:[#allocation2 + $0x38] sm:$0xff] }
  0x11   :  { %v744_v16 = vsub.f32 %v59_v4, %v731_v7  ;;  %v747_v17 = vsub.f32 %v58_v5, %v733_v8  ;;  %126 = vmatpush.msra.mxu0 %v731_v7  ;;  %599 = vmatpush.msra.mxu2 %v731_v7  ;;  %v755_v19 = vsub.f32 %v56_v10, %v737_v13  ;;  %v53_v44 = vld [vmem:[#allocation5 + $0x8] sm:$0xff]  ;;  %v52_v46 = vld [vmem:[#allocation5] sm:$0xff] }
  0x12   :  { %v758_v20 = vsub.f32 %v55_v11, %v739_v14  ;;  %v228_v24 = vand.u32 4294901760, %v750_v18  ;;  %v765_v25 = vsub.f32 %v54_v12, %v741_v15  ;;  %v137_v45 = vand.u32 4294901760, %v53_v44 }
  0x13   :  { %v216_v22 = vand.u32 4294901760, %v744_v16  ;;  %v222_v23 = vand.u32 4294901760, %v747_v17  ;;  %128 = vmatpush.msra.mxu0 %v733_v8  ;;  %600 = vmatpush.msra.mxu2 %v733_v8  ;;  %v234_v26 = vand.u32 4294901760, %v755_v19  ;;  %v139_v48 = vand.u32 4294901760, %v52_v46 }
  0x14   :  { %v229_v29 = vsub.f32 %v750_v18, %v228_v24  ;;  %v240_v30 = vand.u32 4294901760, %v758_v20  ;;  %v246_v34 = vand.u32 4294901760, %v765_v25  ;;  %v251_v47 = vsub.f32 %v53_v44, %v137_v45 }
  0x15   :  { %61 = vxpose.xlu0.b32.cont [2/8] (short) (narrow) %v45_v1, 64  ;;  %v217_v27 = vsub.f32 %v744_v16, %v216_v22  ;;  %v223_v28 = vsub.f32 %v747_v17, %v222_v23  ;;  %130 = vmatpush.msra.mxu0 %v735_v9  ;;  %v235_v33 = vsub.f32 %v755_v19, %v234_v26 }
  0x16   :  { %601 = vmatpush.msra.mxu2 %v735_v9  ;;  %v230_v35 = vand.u32 4294901760, %v229_v29  ;;  %v241_v36 = vsub.f32 %v758_v20, %v240_v30  ;;  %v247_v39 = vsub.f32 %v765_v25, %v246_v34  ;;  %v252_v49 = vand.u32 4294901760, %v251_v47 }
  0x17   :  { %v218_v31 = vand.u32 4294901760, %v217_v27  ;;  %v224_v32 = vand.u32 4294901760, %v223_v28  ;;  %132 = vmatpush.msra.mxu0 %v737_v13  ;;  %v236_v38 = vand.u32 4294901760, %v235_v33  ;;  %v257_v50 = vsub.f32 %v52_v46, %v139_v48 }
  0x18   :  { %602 = vmatpush.msra.mxu2 %v737_v13  ;;  %v242_v40 = vand.u32 4294901760, %v241_v36  ;;  %v248_v41 = vand.u32 4294901760, %v247_v39  ;;  %v253_v51 = vsub.f32 %v251_v47, %v252_v49 }
  0x19   :  { %219 = vmatpush.msra.mxu1 %v218_v31  ;;  %134 = vmatpush.msra.mxu0 %v739_v14  ;;  %v258_v52 = vand.u32 4294901760, %v257_v50 }
  0x1a   :  { %607 = vmatpush.msra.mxu3 %v218_v31  ;;  %603 = vmatpush.msra.mxu2 %v739_v14  ;;  %v254_v53 = vand.u32 4294901760, %v253_v51 }
  0x1b   :  { %225 = vmatpush.msra.mxu1 %v224_v32  ;;  %136 = vmatpush.msra.mxu0 %v741_v15  ;;  %v259_v54 = vsub.f32 %v257_v50, %v258_v52 }
  0x1c   :  { %608 = vmatpush.msra.mxu3 %v224_v32  ;;  %604 = vmatpush.msra.mxu2 %v741_v15 }
  0x1d   :  { %62 = vxpose.xlu0.b32.cont [3/8] (short) (narrow) %v46_v2, 64  ;;  %231 = vmatpush.msra.mxu1 %v230_v35  ;;  %v260_v55 = vand.u32 4294901760, %v259_v54 }
  0x1e   :  { %609 = vmatpush.msra.mxu3 %v230_v35  ;;  %138 = vmatpush.msra.mxu0 %v137_v45 }
  0x1f   :  { %237 = vmatpush.msra.mxu1 %v236_v38  ;;  %605 = vmatpush.msra.mxu2 %v137_v45 }
  0x20   :  { %610 = vmatpush.msra.mxu3 %v236_v38  ;;  %140 = vmatpush.msra.mxu0 %v139_v48 }
  0x21   :  { %243 = vmatpush.msra.mxu1 %v242_v40  ;;  %606 = vmatpush.msra.mxu2 %v139_v48 }
  0x22   :  { %611 = vmatpush.msra.mxu3 %v242_v40  ;;  %452 = vmatpush.msrb.mxu0 %v216_v22 }
  0x23   :  { %249 = vmatpush.msra.mxu1 %v248_v41  ;;  %305 = vmatpush.msrb.mxu2 %v744_v16 }
  0x24   :  { %612 = vmatpush.msra.mxu3 %v248_v41  ;;  %456 = vmatpush.msrb.mxu0 %v222_v23 }
  0x25   :  { %63 = vxpose.xlu0.b32.cont [4/8] (short) (narrow) %v47_v3, 64  ;;  %308 = vmatpush.msrb.mxu2 %v747_v17 }
  0x26   :  { %460 = vmatpush.msrb.mxu0 %v228_v24  ;;  %255 = vmatpush.msra.mxu1 %v254_v53 }
  0x27   :  { %311 = vmatpush.msrb.mxu2 %v750_v18  ;;  %613 = vmatpush.msra.mxu3 %v254_v53 }
  0x28   :  { %464 = vmatpush.msrb.mxu0 %v234_v26  ;;  %261 = vmatpush.msra.mxu1 %v260_v55 }
  0x29   :  { %314 = vmatpush.msrb.mxu2 %v755_v19  ;;  %614 = vmatpush.msra.mxu3 %v260_v55 }
  0x2a   :  { %523 = vmatpush.msrb.mxu1 %v731_v7  ;;  %468 = vmatpush.msrb.mxu0 %v240_v30 }
  0x2b   :  { %377 = vmatpush.msrb.mxu3 %v731_v7  ;;  %317 = vmatpush.msrb.mxu2 %v758_v20 }
  0x2c   :  { %525 = vmatpush.msrb.mxu1 %v733_v8  ;;  %472 = vmatpush.msrb.mxu0 %v246_v34 }
  0x2d   :  { %64 = vxpose.xlu0.b32.cont [5/8] (short) (narrow) %v48_v21, 64  ;;  %379 = vmatpush.msrb.mxu3 %v733_v8 }
  0x2e   :  { %320 = vmatpush.msrb.mxu2 %v765_v25  ;;  %527 = vmatpush.msrb.mxu1 %v735_v9 }
  0x2f   :  { %476 = vmatpush.msrb.mxu0 %v252_v49  ;;  %381 = vmatpush.msrb.mxu3 %v735_v9 }
  0x30   :  { %323 = vmatpush.msrb.mxu2 %v251_v47  ;;  %529 = vmatpush.msrb.mxu1 %v737_v13 }
  0x31   :  { %480 = vmatpush.msrb.mxu0 %v258_v52  ;;  %383 = vmatpush.msrb.mxu3 %v737_v13 }
  0x32   :  { %326 = vmatpush.msrb.mxu2 %v257_v50  ;;  %531 = vmatpush.msrb.mxu1 %v739_v14 }
  0x33   :  { %385 = vmatpush.msrb.mxu3 %v739_v14 }
  0x34   :  { %533 = vmatpush.msrb.mxu1 %v741_v15 }
  0x35   :  { %65 = vxpose.xlu0.b32.cont [6/8] (short) (narrow) %v49_v37, 64  ;;  %387 = vmatpush.msrb.mxu3 %v741_v15 }
  0x36   :  { %535 = vmatpush.msrb.mxu1 %v137_v45 }
  0x37   :  { %389 = vmatpush.msrb.mxu3 %v137_v45 }
  0x38   :  { %537 = vmatpush.msrb.mxu1 %v139_v48 }
  0x39   :  { %391 = vmatpush.msrb.mxu3 %v139_v48 }
  0x3d   :  { %66 = vxpose.xlu0.b32.cont [7/8] (short) (narrow) %v50_v42, 64 }
  0x45   :  { %67 = vxpose.xlu0.b32.end [8/8] (short) (narrow) %v51_v43, 64 }
  0xb1   :  { %v76_v56 = vpop.trf.xlu0 }
  0xb2   :  { %v94_v57 = vsel %vm92_vm0, %v76_v56, 0 }
  0xb3   :  { %v141_v58 = vand.u32 4294901760, %v94_v57 }
  0xb5   :  { %v820_v59 = vsub.f32 %v94_v57, %v141_v58  ;;  %263 = vmatmul.f32.vlgmr.msra.gmra.mxu1 %v141_v58 }
  0xb7   :  { %v143_v60 = vand.u32 4294901760, %v820_v59 }
  0xb9   :  { %v77_v61 = vpop.trf.xlu0  ;;  %v144_v62 = vsub.f32 %v820_v59, %v143_v60 }
  0xba   :  { %v97_v63 = vsel %vm92_vm0, %v77_v61, 0 }
  0xbb   :  { %v149_v0 = vand.u32 4294901760, %v97_v63  ;;  %v145_v1 = vand.u32 4294901760, %v144_v62 }
  0xbd   :  { %v827_v2 = vsub.f32 %v97_v63, %v149_v0  ;;  %146 = vmatmul.f32.vlgmr.msra.gmra.mxu0 %v145_v1  ;;  %267 = vmatmul.f32.gmra.mxu1 %v149_v0 }
  0xbf   :  { %v151_v3 = vand.u32 4294901760, %v827_v2 }
  0xc1   :  { %v78_v4 = vpop.trf.xlu0  ;;  %v152_v5 = vsub.f32 %v827_v2, %v151_v3 }
  0xc2   :  { %v100_v6 = vsel %vm92_vm0, %v78_v4, 0 }
  0xc3   :  { %v157_v7 = vand.u32 4294901760, %v100_v6  ;;  %v153_v8 = vand.u32 4294901760, %v152_v5 }
  0xc5   :  { %v834_v9 = vsub.f32 %v100_v6, %v157_v7  ;;  %154 = vmatmul.f32.gmra.mxu0 %v153_v8  ;;  %271 = vmatmul.f32.gmra.mxu1 %v157_v7 }
  0xc7   :  { %v159_v10 = vand.u32 4294901760, %v834_v9 }
  0xc9   :  { %v79_v11 = vpop.trf.xlu0  ;;  %v160_v12 = vsub.f32 %v834_v9, %v159_v10 }
  0xca   :  { %v103_v13 = vsel %vm92_vm0, %v79_v11, 0 }
  0xcb   :  { %v165_v14 = vand.u32 4294901760, %v103_v13  ;;  %v161_v15 = vand.u32 4294901760, %v160_v12 }
  0xcd   :  { %v841_v16 = vsub.f32 %v103_v13, %v165_v14  ;;  %162 = vmatmul.f32.gmra.mxu0 %v161_v15  ;;  %275 = vmatmul.f32.gmra.mxu1 %v165_v14 }
  0xcf   :  { %v167_v17 = vand.u32 4294901760, %v841_v16 }
  0xd1   :  { %v80_v18 = vpop.trf.xlu0  ;;  %v168_v19 = vsub.f32 %v841_v16, %v167_v17 }
  0xd2   :  { %v106_v20 = vsel %vm92_vm0, %v80_v18, 0 }
  0xd3   :  { %v173_v21 = vand.u32 4294901760, %v106_v20  ;;  %v169_v22 = vand.u32 4294901760, %v168_v19 }
  0xd5   :  { %v174_v23 = vsub.f32 %v106_v20, %v173_v21  ;;  %170 = vmatmul.f32.gmra.mxu0 %v169_v22  ;;  %279 = vmatmul.f32.vlgmr.msra.gmra.mxu3 %v173_v21 }
  0xd6   :  { %539 = vmatmul.f32.vlgmr.msrb.gmra.mxu1 %v141_v58 }
  0xd7   :  { %v175_v24 = vand.u32 4294901760, %v174_v23 }
  0xd9   :  { %v81_v25 = vpop.trf.xlu0  ;;  %v176_v26 = vsub.f32 %v174_v23, %v175_v24 }
  0xda   :  { %v109_v27 = vsel %vm92_vm0, %v81_v25, 0 }
  0xdb   :  { %v181_v28 = vand.u32 4294901760, %v109_v27  ;;  %v177_v29 = vand.u32 4294901760, %v176_v26 }
  0xdd   :  { %v182_v30 = vsub.f32 %v109_v27, %v181_v28  ;;  %178 = vmatmul.f32.vlgmr.msra.gmra.mxu2 %v177_v29  ;;  %283 = vmatmul.f32.gmra.mxu3 %v181_v28 }
  0xde   :  { %482 = vmatmul.f32.vlgmr.msrb.gmra.mxu0 %v141_v58  ;;  %543 = vmatmul.f32.gmra.mxu1 %v149_v0 }
  0xdf   :  { %v183_v31 = vand.u32 4294901760, %v182_v30 }
  0xe1   :  { %v82_v32 = vpop.trf.xlu0  ;;  %v184_v33 = vsub.f32 %v182_v30, %v183_v31 }
  0xe2   :  { %v112_v34 = vsel %vm92_vm0, %v82_v32, 0 }
  0xe3   :  { %v189_v35 = vand.u32 4294901760, %v112_v34  ;;  %v185_v36 = vand.u32 4294901760, %v184_v33 }
  0xe5   :  { %v190_v37 = vsub.f32 %v112_v34, %v189_v35  ;;  %186 = vmatmul.f32.gmra.mxu2 %v185_v36  ;;  %287 = vmatmul.f32.gmra.mxu3 %v189_v35 }
  0xe6   :  { %486 = vmatmul.f32.gmra.mxu0 %v149_v0  ;;  %547 = vmatmul.f32.gmra.mxu1 %v157_v7 }
  0xe7   :  { %v191_v38 = vand.u32 4294901760, %v190_v37 }
  0xe9   :  { %v83_v39 = vpop.trf.xlu0  ;;  %v192_v40 = vsub.f32 %v190_v37, %v191_v38 }
  0xea   :  { %v115_v41 = vsel %vm92_vm0, %v83_v39, 0 }
  0xeb   :  { %v197_v42 = vand.u32 4294901760, %v115_v41  ;;  %v193_v43 = vand.u32 4294901760, %v192_v40 }
  0xed   :  { %v198_v44 = vsub.f32 %v115_v41, %v197_v42  ;;  %194 = vmatmul.f32.gmra.mxu2 %v193_v43  ;;  %291 = vmatmul.f32.gmra.mxu3 %v197_v42 }
  0xee   :  { %490 = vmatmul.f32.gmra.mxu0 %v157_v7  ;;  %551 = vmatmul.f32.gmra.mxu1 %v165_v14 }
  0xef   :  { %v199_v45 = vand.u32 4294901760, %v198_v44 }
  0xf1   :  { %v200_v46 = vsub.f32 %v198_v44, %v199_v45 }
  0xf3   :  { %v201_v47 = vand.u32 4294901760, %v200_v46 }
  0xf5   :  { %202 = vmatmul.f32.gmra.mxu2 %v201_v47  ;;  %395 = vmatmul.f32.vlgmr.msrb.gmra.mxu3 %v143_v60 }
  0xf6   :  { %494 = vmatmul.f32.gmra.mxu0 %v165_v14  ;;  %555 = vmatmul.f32.gmra.mxu1 %v173_v21 }
  0xfd   :  { %329 = vmatmul.f32.vlgmr.msrb.gmra.mxu2 %v820_v59  ;;  %401 = vmatmul.f32.gmra.mxu3 %v151_v3 }
  0xfe   :  { %498 = vmatmul.f32.gmra.mxu0 %v173_v21  ;;  %559 = vmatmul.f32.gmra.mxu1 %v181_v28 }
 0x105   :  { %334 = vmatmul.f32.gmra.mxu2 %v827_v2  ;;  %407 = vmatmul.f32.gmra.mxu3 %v159_v10 }
 0x106   :  { %502 = vmatmul.f32.gmra.mxu0 %v181_v28  ;;  %563 = vmatmul.f32.gmra.mxu1 %v189_v35 }
 0x10d   :  { %339 = vmatmul.f32.gmra.mxu2 %v834_v9  ;;  %413 = vmatmul.f32.gmra.mxu3 %v167_v17 }
 0x10e   :  { %506 = vmatmul.f32.gmra.mxu0 %v189_v35  ;;  %567 = vmatmul.f32.gmra.mxu1 %v197_v42 }
 0x115   :  { %344 = vmatmul.f32.gmra.mxu2 %v841_v16  ;;  %419 = vmatmul.f32.gmra.mxu3 %v175_v24 }
 0x116   :  { %510 = vmatmul.f32.gmra.mxu0 %v197_v42 }
 0x11d   :  { %349 = vmatmul.f32.gmra.mxu2 %v174_v23  ;;  %425 = vmatmul.f32.gmra.mxu3 %v183_v31 }
 0x125   :  { %354 = vmatmul.f32.gmra.mxu2 %v182_v30  ;;  %431 = vmatmul.f32.gmra.mxu3 %v191_v38 }
 0x12d   :  { %359 = vmatmul.f32.gmra.mxu2 %v190_v37  ;;  %437 = vmatmul.f32.gmra.mxu3 %v199_v45 }
 0x132   :  { %v264_v49 = vpop.f32.mrf.mxu1 }
 0x135   :  { %364 = vmatmul.f32.gmra.mxu2 %v198_v44 }
 0x13a   :  { %v147_v48 = vpop.f32.mrf.mxu0  ;;  %v268_v52 = vpop.f32.mrf.mxu1 }
 0x13b   :  { %v265_v3 = vadd.f32 %v264_v49, %v147_v48 }
 0x142   :  { %v155_v50 = vpop.f32.mrf.mxu0  ;;  %v272_v56 = vpop.f32.mrf.mxu1 }
 0x143   :  { %v269_v11 = vadd.f32 %v268_v52, %v155_v50 }
 0x14a   :  { %v163_v55 = vpop.f32.mrf.mxu0  ;;  %v276_v60 = vpop.f32.mrf.mxu1 }
 0x14b   :  { %v273_v20 = vadd.f32 %v272_v56, %v163_v55 }
 0x152   :  { %v171_v59 = vpop.f32.mrf.mxu0 }
 0x153   :  { %v540_v0 = vpop.f32.mrf.mxu1  ;;  %v277_v29 = vadd.f32 %v276_v60, %v171_v59 }
 0x158   :  { %v280_v51 = vpop.f32.mrf.mxu3 }
 0x15b   :  { %v483_v63 = vpop.f32.mrf.mxu0  ;;  %v544_v8 = vpop.f32.mrf.mxu1 }
 0x160   :  { %v179_v53 = vpop.f32.mrf.mxu2  ;;  %v284_v54 = vpop.f32.mrf.mxu3 }
 0x161   :  { %v281_v37 = vadd.f32 %v280_v51, %v179_v53 }
 0x163   :  { %v487_v4 = vpop.f32.mrf.mxu0  ;;  %v548_v18 = vpop.f32.mrf.mxu1 }
 0x168   :  { %v187_v57 = vpop.f32.mrf.mxu2  ;;  %v859_v58 = vpop.f32.mrf.mxu3 }
 0x169   :  { %v285_v45 = vadd.f32 %v284_v54, %v187_v57 }
 0x16b   :  { %v491_v16 = vpop.f32.mrf.mxu0  ;;  %v552_v28 = vpop.f32.mrf.mxu1 }
 0x170   :  { %v195_v61 = vpop.f32.mrf.mxu2  ;;  %v861_v62 = vpop.f32.mrf.mxu3 }
 0x171   :  { %v289_v56 = vadd.f32 %v859_v58, %v195_v61 }
 0x173   :  { %v495_v26 = vpop.f32.mrf.mxu0  ;;  %v556_v39 = vpop.f32.mrf.mxu1 }
 0x178   :  { %v863_v1 = vpop.f32.mrf.mxu2  ;;  %v396_v2 = vpop.f32.mrf.mxu3 }
 0x179   :  { %v293_v54 = vadd.f32 %v861_v62, %v863_v1 }
 0x17b   :  { %v499_v36 = vpop.f32.mrf.mxu0  ;;  %v560_v50 = vpop.f32.mrf.mxu1 }
 0x180   :  { %v330_v5 = vpop.f32.mrf.mxu2  ;;  %v402_v6 = vpop.f32.mrf.mxu3 }
 0x181   :  { %v331_v7 = vadd.f32 %v330_v5, %v265_v3 }
 0x183   :  { %v397_v9 = vadd.f32 %v396_v2, %v331_v7  ;;  %v503_v47 = vpop.f32.mrf.mxu0  ;;  %v564_v2 = vpop.f32.mrf.mxu1 }
 0x185   :  { %v484_v10 = vadd.f32 %v483_v63, %v397_v9 }
 0x187   :  { %v541_v12 = vadd.f32 %v540_v0, %v484_v10 }
 0x188   :  { %v335_v13 = vpop.f32.mrf.mxu2  ;;  %v408_v14 = vpop.f32.mrf.mxu3 }
 0x189   :  { %571 = vst [vmem:[#allocation7] sm:$0xff] %v541_v12  ;;  %v336_v15 = vadd.f32 %v335_v13, %v269_v11 }
 0x18b   :  { %v403_v17 = vadd.f32 %v402_v6, %v336_v15  ;;  %v507_v63 = vpop.f32.mrf.mxu0  ;;  %v568_v61 = vpop.f32.mrf.mxu1 }
 0x18d   :  { %v488_v19 = vadd.f32 %v487_v4, %v403_v17 }
 0x18f   :  { %v545_v21 = vadd.f32 %v544_v8, %v488_v19 }
 0x190   :  { %v340_v22 = vpop.f32.mrf.mxu2  ;;  %v414_v24 = vpop.f32.mrf.mxu3 }
 0x191   :  { %572 = vst [vmem:[#allocation7 + $0x8] sm:$0xff] %v545_v21  ;;  %v341_v23 = vadd.f32 %v340_v22, %v273_v20 }
 0x193   :  { %v409_v25 = vadd.f32 %v408_v14, %v341_v23  ;;  %v511_v8 = vpop.f32.mrf.mxu0 }
 0x195   :  { %v492_v27 = vadd.f32 %v491_v16, %v409_v25 }
 0x197   :  { %v549_v30 = vadd.f32 %v548_v18, %v492_v27 }
 0x198   :  { %v345_v31 = vpop.f32.mrf.mxu2  ;;  %v420_v34 = vpop.f32.mrf.mxu3 }
 0x199   :  { %573 = vst [vmem:[#allocation7 + $0x10] sm:$0xff] %v549_v30  ;;  %v346_v32 = vadd.f32 %v345_v31, %v277_v29 }
 0x19b   :  { %v415_v33 = vadd.f32 %v414_v24, %v346_v32 }
 0x19d   :  { %v496_v35 = vadd.f32 %v495_v26, %v415_v33 }
 0x19f   :  { %v553_v38 = vadd.f32 %v552_v28, %v496_v35 }
 0x1a0   :  { %v350_v40 = vpop.f32.mrf.mxu2  ;;  %v426_v44 = vpop.f32.mrf.mxu3 }
 0x1a1   :  { %574 = vst [vmem:[#allocation7 + $0x18] sm:$0xff] %v553_v38  ;;  %v351_v41 = vadd.f32 %v350_v40, %v281_v37 }
 0x1a3   :  { %v421_v42 = vadd.f32 %v420_v34, %v351_v41 }
 0x1a5   :  { %v500_v43 = vadd.f32 %v499_v36, %v421_v42 }
 0x1a7   :  { %v557_v46 = vadd.f32 %v556_v39, %v500_v43 }
 0x1a8   :  { %v355_v48 = vpop.f32.mrf.mxu2  ;;  %v432_v53 = vpop.f32.mrf.mxu3 }
 0x1a9   :  { %575 = vst [vmem:[#allocation7 + $0x20] sm:$0xff] %v557_v46  ;;  %v356_v49 = vadd.f32 %v355_v48, %v285_v45 }
 0x1ab   :  { %v427_v52 = vadd.f32 %v426_v44, %v356_v49 }
 0x1ad   :  { %v504_v55 = vadd.f32 %v503_v47, %v427_v52 }
 0x1af   :  { %v561_v51 = vadd.f32 %v560_v50, %v504_v55 }
 0x1b0   :  { %v360_v59 = vpop.f32.mrf.mxu2  ;;  %v438_v6 = vpop.f32.mrf.mxu3 }
 0x1b1   :  { %576 = vst [vmem:[#allocation7 + $0x28] sm:$0xff] %v561_v51  ;;  %v361_v60 = vadd.f32 %v360_v59, %v289_v56 }
 0x1b3   :  { %v433_v0 = vadd.f32 %v432_v53, %v361_v60 }
 0x1b5   :  { %v508_v3 = vadd.f32 %v507_v63, %v433_v0 }
 0x1b7   :  { %v565_v57 = vadd.f32 %v564_v2, %v508_v3 }
 0x1b8   :  { %v365_v4 = vpop.f32.mrf.mxu2 }
 0x1b9   :  { %577 = vst [vmem:[#allocation7 + $0x30] sm:$0xff] %v565_v57  ;;  %v366_v5 = vadd.f32 %v365_v4, %v293_v54 }
 0x1bb   :  { %v439_v7 = vadd.f32 %v438_v6, %v366_v5 }
 0x1bd   :  { %v512_v58 = vadd.f32 %v511_v8, %v439_v7 }
 0x1bf   :  { %v569_v9 = vadd.f32 %v568_v61, %v512_v58 }
 0x1c1   :  { %578 = vst [vmem:[#allocation7 + $0x38] sm:$0xff] %v569_v9 }
 0x1c2   :  { %591 = dma.vmem_to_hbm [thread:$0]  %s584_s1, 1024, %s586_s23, [#allocation4], %s700_s17, %s700_s17, %s701_s18  }
 0x1c3   :  { %697 = dma.done.wait [#allocation4], 1024  }
 0x1c4   :  { %698 = vsyncadd [#allocation4], 4294966272 }
 0x1c5   :  { %596 = vsyncpa [#allocation3], 1 }
 0x1c6   :  { %597 = vsyncpa [#allocation6], 1 }
 0x1c7   :  { %598 = vsyncpa [#allocation4], 1 }

</bundles_post_ra>
